<compile_context>
chip_gen: v6e
topology: v6e:2x2x1
jax: 0.10.0
libtpu: 0.0.40
codegen_flags: <defaults>
</compile_context>

<pallas_src>
import functools

import jax
import jax.numpy as jnp
from jax.experimental import pallas as pl
from jax.experimental.pallas import tpu as pltpu

_LANE = 128


# ----------------------------------------------------------------------------
# VMEM sizing helpers (generation-aware).
# ----------------------------------------------------------------------------
def _vmem_capacity_bytes():
    """Per-core VMEM capacity; conservative 64 MiB (v7x) if the query fails."""
    try:
        return int(pltpu.get_tpu_info().vmem_capacity_bytes)
    except Exception:
        return 64 << 20


def _vmem_limit_bytes(live_bytes, capacity):
    """Scoped-VMEM request derived from the actual live block bytes plus
    headroom for Mosaic internal scratch, capped under physical capacity."""
    return int(min(max(live_bytes + (8 << 20), 32 << 20), capacity - (8 << 20)))


def _pick_spatial_tile(hw, per_col_bytes, budget_bytes, min_tiles=1):
    """Largest lane-aligned spatial tile whose live blocks fit `budget_bytes`.
    `min_tiles > 1` forces at least that many tiles so both v7x TensorCores
    get work for single-image inference (no cost on 1-TC chips)."""
    target = max(512, budget_bytes // max(per_col_bytes, 1))
    if min_tiles > 1 and hw >= min_tiles * _LANE:
        target = min(target, hw // min_tiles)
    if hw <= target:
        return hw                                    # full dim — always legal
    return max(_LANE, (target // _LANE) * _LANE)


# ----------------------------------------------------------------------------
# Kernel 1: per-channel sum / sum-of-squares (BatchNorm batch statistics) on
# the NCHW view, plus (optionally) a low-precision copy of x for the conv
# pass.  Grid = (N, G, tiles_per_group); (N, G) are parallel, the tile axis is
# a serial accumulation into the per-(n, g) partial sums.
# ----------------------------------------------------------------------------
def _bn_stats_kernel(x_ref, *out_refs, hw, ts, tpg, num_t, emit_cast):
    sum_ref, sq_ref = out_refs[0], out_refs[1]
    t = pl.program_id(2)

    @pl.when(t == 0)
    def _():
        sum_ref[...] = jnp.zeros_like(sum_ref)
        sq_ref[...] = jnp.zeros_like(sq_ref)

    x = x_ref[...].astype(jnp.float32)                      # (Cin, ts)

    if emit_cast:
        # Low-precision copy of x for the conv pass (fused with the stats
        # read, so no standalone cast op / extra x read).  Out-of-bounds
        # lanes of a partial last tile are dropped by the pipeline.
        out_refs[2][...] = x_ref[...].astype(out_refs[2].dtype)

    def _acc(xv):
        sum_ref[...] += jnp.sum(xv, axis=1, keepdims=True)   # (Cin, 1)
        sq_ref[...] += jnp.sum(xv * xv, axis=1, keepdims=True)

    if hw % ts != 0:
        # Gate the masking so full tiles pay no iota/compare/select work.
        gt = pl.program_id(1) * tpg + t                       # global tile idx

        @pl.when(gt == num_t - 1)
        def _():
            col = (num_t - 1) * ts + jax.lax.broadcasted_iota(jnp.int32, x.shape, 1)
            _acc(jnp.where(col < hw, x, 0.0))

        @pl.when(gt != num_t - 1)
        def _():
            _acc(x)
    else:
        _acc(x)


# ----------------------------------------------------------------------------
# Kernel 2: fused (folded-BN) 1x1 conv + bias + ReLU.
#   out(Cout, ts) = relu(W'(Cout, Cin) @ x(Cin, ts) + b'(Cout, 1))
# x/W' may be bf16; accumulation is f32 via preferred_element_type.
# NOTE: the partial last spatial tile is NOT masked here.  Garbage input
# lanes only produce garbage in the corresponding output lanes, which the
# pipeline drops on write-back.  This invariant would break if this kernel
# ever reduced across the spatial axis — it must not.
# ----------------------------------------------------------------------------
def _bn_conv_relu_kernel(x_ref, w_ref, b_ref, o_ref):
    y = jnp.dot(w_ref[...], x_ref[...], preferred_element_type=jnp.float32)
    y = y + b_ref[...]                                       # (Cout,1) lane-broadcast
    o_ref[...] = jnp.maximum(y, 0.0).astype(o_ref.dtype)


# ----------------------------------------------------------------------------
# Host wrapper.
# ----------------------------------------------------------------------------
def aspp_module_forward(x_nchw, gamma, beta, weight_oc, *, eps=1e-5,
                        conv_in_dtype=jnp.bfloat16, vmem_block_budget=None):
    """Forward of _ASPPModule (kernel_size=1 branch).

    x_nchw:        (N, Cin, H, W) float32
    gamma/beta:    (Cin,)          BatchNorm affine params
    weight_oc:     (Cout, Cin)     Conv2d 1x1 weight (spatial dims squeezed)
    conv_in_dtype: dtype fed to the MXU for the conv pass (bf16 recommended;
                   accumulation is always f32, output keeps x's dtype)
    returns        (N, Cout, H, W) in x's dtype
    """
    N, Cin, H, W = x_nchw.shape
    Cout = weight_oc.shape[0]
    HW = H * W
    R = N * HW

    conv_in_dtype = jnp.dtype(conv_in_dtype)
    emit_cast = conv_in_dtype != x_nchw.dtype
    cast_item = conv_in_dtype.itemsize
    x_item = jnp.dtype(x_nchw.dtype).itemsize

    cap = _vmem_capacity_bytes()
    if vmem_block_budget is None:
        vmem_block_budget = min(int(cap * 0.6), 96 << 20)
    else:
        vmem_block_budget = min(int(vmem_block_budget), int(cap * 0.6))

    # Free reshape: keep NCHW ordering, spatial on the lane axis.
    x3 = x_nchw.reshape(N, Cin, HW)

    min_tiles = 2 if N == 1 else 1   # keep both v7x cores busy for N == 1

    # --- pass 1 tiling: only its own blocks are charged ---------------------
    per_col_s = 2 * x_item * Cin + (2 * cast_item * Cin if emit_cast else 0)
    ts_s = _pick_spatial_tile(HW, per_col_s, vmem_block_budget, min_tiles)
    num_t_s = pl.cdiv(HW, ts_s)
    # Group split (parallel axis) for small batches, only when it divides the
    # tile count evenly (keeps every block index valid, no revisiting).
    G = 2 if (N == 1 and num_t_s >= 2 and num_t_s % 2 == 0) else 1
    tpg = num_t_s // G

    stats_live = (2 * x_item * Cin * ts_s
                  + (2 * cast_item * Cin * ts_s if emit_cast else 0)
                  + 4 * (4 * Cin))
    vlim_stats = _vmem_limit_bytes(stats_live, cap)

    stats_out_shapes = [
        jax.ShapeDtypeStruct((N, G, Cin, 1), jnp.float32),
        jax.ShapeDtypeStruct((N, G, Cin, 1), jnp.float32),
    ]
    stats_out_specs = [
        pl.BlockSpec((None, None, Cin, 1), lambda n, g, t: (n, g, 0, 0)),
        pl.BlockSpec((None, None, Cin, 1), lambda n, g, t: (n, g, 0, 0)),
    ]
    if emit_cast:
        stats_out_shapes.append(jax.ShapeDtypeStruct((N, Cin, HW), conv_in_dtype))
        stats_out_specs.append(
            pl.BlockSpec((None, Cin, ts_s), lambda n, g, t: (n, 0, g * tpg + t)))

    stats_res = pl.pallas_call(
        functools.partial(_bn_stats_kernel, hw=HW, ts=ts_s, tpg=tpg,
                          num_t=num_t_s, emit_cast=emit_cast),
        out_shape=tuple(stats_out_shapes),
        grid_spec=pltpu.PrefetchScalarGridSpec(
            num_scalar_prefetch=0,
            grid=(N, G, tpg),
            in_specs=[pl.BlockSpec((None, Cin, ts_s),
                                   lambda n, g, t: (n, 0, g * tpg + t))],
            out_specs=tuple(stats_out_specs),
        ),
        compiler_params=pltpu.CompilerParams(
            dimension_semantics=("parallel", "parallel", "arbitrary"),
            vmem_limit_bytes=vlim_stats),
    )(x3)

    part_sum, part_sq = stats_res[0], stats_res[1]
    x_conv = stats_res[2] if emit_cast else x3

    # --- fold BN (batch stats + affine) into the 1x1 conv --------------------
    sums = jnp.sum(part_sum, axis=(0, 1))[:, 0]        # (Cin,)
    sqs = jnp.sum(part_sq, axis=(0, 1))[:, 0]          # (Cin,)
    mean = sums / R
    var = jnp.maximum(sqs / R - mean * mean, 0.0)      # biased var, clamped >= 0
    scale = gamma.astype(jnp.float32) * jax.lax.rsqrt(var + eps)   # (Cin,)
    shift = beta.astype(jnp.float32) - mean * scale                # (Cin,)

    w_f32 = weight_oc.astype(jnp.float32)
    w_folded = (w_f32 * scale[None, :]).astype(conv_in_dtype)      # (Cout, Cin)
    # Bias stays f32 and is computed without an MXU matvec (precision-safe).
    bias = jnp.sum(w_f32 * shift[None, :], axis=1, keepdims=True)  # (Cout, 1)

    # --- pass 2 tiling / limits ---------------------------------------------
    per_col_c = 2 * cast_item * Cin + 2 * 4 * Cout
    ts_c = _pick_spatial_tile(HW, per_col_c, vmem_block_budget, min_tiles)
    num_t_c = pl.cdiv(HW, ts_c)
    conv_live = (2 * cast_item * Cin * ts_c + 2 * 4 * Cout * ts_c
                 + 2 * cast_item * Cout * Cin + 2 * 4 * Cout)
    vlim_conv = _vmem_limit_bytes(conv_live, cap)

    # --- pass 2: fused conv1x1 + bias + ReLU, output directly in NCHW -------
    out3 = pl.pallas_call(
        _bn_conv_relu_kernel,
        out_shape=jax.ShapeDtypeStruct((N, Cout, HW), x_nchw.dtype),
        grid_spec=pltpu.PrefetchScalarGridSpec(
            num_scalar_prefetch=0,
            grid=(N, num_t_c),
            in_specs=[
                pl.BlockSpec((None, Cin, ts_c), lambda n, t: (n, 0, t)),
                pl.BlockSpec((Cout, Cin), lambda n, t: (0, 0)),
                pl.BlockSpec((Cout, 1), lambda n, t: (0, 0)),
            ],
            out_specs=pl.BlockSpec((None, Cout, ts_c), lambda n, t: (n, 0, t)),
        ),
        compiler_params=pltpu.CompilerParams(
            dimension_semantics=("parallel", "parallel"),
            vmem_limit_bytes=vlim_conv),
    )(x_conv, w_folded, bias)

    # Free reshape back to NCHW.
    return out3.reshape(N, Cout, H, W)


# ----------------------------------------------------------------------------
# Pure-JAX references for correctness checks.
# ----------------------------------------------------------------------------
def _ref_forward(x, gamma, beta, weight_oc, eps=1e-5):
    """Plain BN -> 1x1 conv -> ReLU (mirrors the PyTorch module, f32)."""
    mean = jnp.mean(x, axis=(0, 2, 3), keepdims=True)
    var = jnp.mean((x - mean) ** 2, axis=(0, 2, 3), keepdims=True)
    xn = (x - mean) * jax.lax.rsqrt(var + eps)
    xn = xn * gamma[None, :, None, None] + beta[None, :, None, None]
    y = jnp.einsum("oc,nchw->nohw", weight_oc, xn,
                   precision=jax.lax.Precision.HIGHEST)
    return jnp.maximum(y, 0.0)


def _ref_forward_lowp(x, gamma, beta, weight_oc, eps=1e-5,
                      conv_in_dtype=jnp.bfloat16):
    """Mirrors the kernel's fold + low-precision conv feed:
       out = relu( round(W*scale) @ round(x) + W @ shift ), f32 accumulation."""
    mean = jnp.mean(x, axis=(0, 2, 3))
    var = jnp.mean((x - mean[None, :, None, None]) ** 2, axis=(0, 2, 3))
    scale = gamma * jax.lax.rsqrt(var + eps)
    shift = beta - mean * scale
    w = weight_oc.astype(jnp.float32)
    w_folded = (w * scale[None, :]).astype(conv_in_dtype).astype(jnp.float32)
    bias = jnp.sum(w * shift[None, :], axis=1)
    xc = x.astype(conv_in_dtype).astype(jnp.float32)
    y = jnp.einsum("oc,nchw->nohw", w_folded, xc,
                   precision=jax.lax.Precision.HIGHEST)
    y = y + bias[None, :, None, None]
    return jnp.maximum(y, 0.0)


if __name__ == "__main__":
    def make_inputs(key, N, Cin, Cout, H, W):
        kx, kg, kb, kw = jax.random.split(key, 4)
        x = jax.random.normal(kx, (N, Cin, H, W), dtype=jnp.float32)
        gamma = 1.0 + 0.1 * jax.random.normal(kg, (Cin,), dtype=jnp.float32)
        beta = 0.1 * jax.random.normal(kb, (Cin,), dtype=jnp.float32)
        weight = jax.random.normal(kw, (Cout, Cin), dtype=jnp.float32) * 0.5
        return x, gamma, beta, weight

    key0, key1 = jax.random.split(jax.random.PRNGKey(0), 2)

    # --- Run A: default bf16 conv feed, single spatial tile ------------------
    x, gamma, beta, weight = make_inputs(key0, 2, 4, 8, 16, 16)
    fwd_bf16 = jax.jit(aspp_module_forward)
    out_a = jax.block_until_ready(fwd_bf16(x, gamma, beta, weight))
    ref_a = _ref_forward_lowp(x, gamma, beta, weight, conv_in_dtype=jnp.bfloat16)
    assert out_a.shape == (2, 8, 16, 16)
    assert jnp.allclose(out_a, ref_a, atol=2e-2, rtol=2e-2), "bf16 path mismatch"

    # --- Run B: f32 conv feed — tight check of the BN-fold math --------------
    fwd_f32 = jax.jit(functools.partial(aspp_module_forward,
                                        conv_in_dtype=jnp.float32))
    out_b = jax.block_until_ready(fwd_f32(x, gamma, beta, weight))
    ref_b = _ref_forward(x, gamma, beta, weight)
    assert jnp.allclose(out_b, ref_b, atol=1e-4, rtol=1e-4), "f32 path mismatch"

    # --- Run C: N=1 — exercises the stats group split and >=2 conv tiles -----
    x1, g1, b1, w1 = make_inputs(key1, 1, 8, 16, 32, 32)
    out_c = jax.block_until_ready(fwd_bf16(x1, g1, b1, w1))
    ref_c = _ref_forward_lowp(x1, g1, b1, w1, conv_in_dtype=jnp.bfloat16)
    assert out_c.shape == (1, 16, 32, 32)
    assert jnp.allclose(out_c, ref_c, atol=2e-2, rtol=2e-2), "multi-tile mismatch"

    print("KERNEL_OK")
</pallas_src>

<mosaic_0001>
module attributes {stable_mosaic.version = 11 : i64} {
  func.func @_bn_stats_kernel(%arg0: i32, %arg1: i32, %arg2: i32, %arg3: memref<1x4x256xf32, #tpu.memory_space<vmem>>, %arg4: memref<1x1x4x1xf32, #tpu.memory_space<vmem>>, %arg5: memref<1x1x4x1xf32, #tpu.memory_space<vmem>>, %arg6: memref<1x4x256xbf16, #tpu.memory_space<vmem>>) attributes {dimension_semantics = [#tpu.dimension_semantics<parallel>, #tpu.dimension_semantics<parallel>, #tpu.dimension_semantics<arbitrary>], iteration_bounds = array<i64: 2, 1, 1>, scalar_prefetch = 0 : i64, scratch_operands = 0 : i64, tpu.core_type = #tpu.core_type<tc>, window_params = [{transform_indices = @transform_0, window_bounds = array<i64: 1, 4, 256>}, {transform_indices = @transform_1, window_bounds = array<i64: 1, 1, 4, 1>}, {transform_indices = @transform_2, window_bounds = array<i64: 1, 1, 4, 1>}, {transform_indices = @transform_3, window_bounds = array<i64: 1, 4, 256>}]} {
    %c0_i32 = arith.constant 0 : i32
    %0 = arith.cmpi eq, %arg2, %c0_i32 : i32
    %1 = arith.extui %0 : i1 to i32
    %c0_i32_0 = arith.constant 0 : i32
    %2 = arith.cmpi ne, %1, %c0_i32_0 : i32
    scf.if %2 {
      %cst_26 = arith.constant 0.000000e+00 : f32
      %28 = vector.broadcast %cst_26 : f32 to vector<4x1xf32>
      %c0_27 = arith.constant 0 : index
      %c0_28 = arith.constant 0 : index
      %c0_29 = arith.constant 0 : index
      %c0_30 = arith.constant 0 : index
      %29 = vector.load %arg4[%c0_27, %c0_28, %c0_29, %c0_30] : memref<1x1x4x1xf32, #tpu.memory_space<vmem>>, vector<1x1x4x1xf32>
      %30 = vector.shape_cast %29 : vector<1x1x4x1xf32> to vector<4x1xf32>
      %31 = vector.shape_cast %28 : vector<4x1xf32> to vector<1x1x4x1xf32>
      tpu.vector_store %arg4[%c0_27, %c0_28, %c0_29, %c0_30], %31 {strides = array<i32>} : memref<1x1x4x1xf32, #tpu.memory_space<vmem>>, vector<1x1x4x1xf32>,
      %cst_31 = arith.constant 0.000000e+00 : f32
      %32 = vector.broadcast %cst_31 : f32 to vector<4x1xf32>
      %c0_32 = arith.constant 0 : index
      %c0_33 = arith.constant 0 : index
      %c0_34 = arith.constant 0 : index
      %c0_35 = arith.constant 0 : index
      %33 = vector.load %arg5[%c0_32, %c0_33, %c0_34, %c0_35] : memref<1x1x4x1xf32, #tpu.memory_space<vmem>>, vector<1x1x4x1xf32>
      %34 = vector.shape_cast %33 : vector<1x1x4x1xf32> to vector<4x1xf32>
      %35 = vector.shape_cast %32 : vector<4x1xf32> to vector<1x1x4x1xf32>
      tpu.vector_store %arg5[%c0_32, %c0_33, %c0_34, %c0_35], %35 {strides = array<i32>} : memref<1x1x4x1xf32, #tpu.memory_space<vmem>>, vector<1x1x4x1xf32>,
    } else {
    }
    %c0 = arith.constant 0 : index
    %c0_1 = arith.constant 0 : index
    %c0_2 = arith.constant 0 : index
    %3 = vector.load %arg3[%c0, %c0_1, %c0_2] : memref<1x4x256xf32, #tpu.memory_space<vmem>>, vector<1x4x256xf32>
    %4 = vector.shape_cast %3 : vector<1x4x256xf32> to vector<4x256xf32>
    %c0_3 = arith.constant 0 : index
    %c0_4 = arith.constant 0 : index
    %c0_5 = arith.constant 0 : index
    %5 = vector.load %arg3[%c0_3, %c0_4, %c0_5] : memref<1x4x256xf32, #tpu.memory_space<vmem>>, vector<1x4x256xf32>
    %6 = vector.shape_cast %5 : vector<1x4x256xf32> to vector<4x256xf32>
    %7 = arith.truncf %6 : vector<4x256xf32> to vector<4x256xbf16>
    %c0_6 = arith.constant 0 : index
    %c0_7 = arith.constant 0 : index
    %c0_8 = arith.constant 0 : index
    %8 = vector.load %arg6[%c0_6, %c0_7, %c0_8] : memref<1x4x256xbf16, #tpu.memory_space<vmem>>, vector<1x4x256xbf16>
    %9 = vector.shape_cast %8 : vector<1x4x256xbf16> to vector<4x256xbf16>
    %10 = vector.shape_cast %7 : vector<4x256xbf16> to vector<1x4x256xbf16>
    tpu.vector_store %arg6[%c0_6, %c0_7, %c0_8], %10 {strides = array<i32>} : memref<1x4x256xbf16, #tpu.memory_space<vmem>>, vector<1x4x256xbf16>,
    %c0_9 = arith.constant 0 : index
    %c0_10 = arith.constant 0 : index
    %c0_11 = arith.constant 0 : index
    %c0_12 = arith.constant 0 : index
    %11 = vector.load %arg4[%c0_9, %c0_10, %c0_11, %c0_12] : memref<1x1x4x1xf32, #tpu.memory_space<vmem>>, vector<1x1x4x1xf32>
    %12 = vector.shape_cast %11 : vector<1x1x4x1xf32> to vector<4x1xf32>
    %cst = arith.constant dense<0.000000e+00> : vector<4xf32>
    %13 = vector.multi_reduction <add>, %4, %cst [1] : vector<4x256xf32> to vector<4xf32>
    %14 = vector.shape_cast %13 : vector<4xf32> to vector<4x1xf32>
    %15 = arith.addf %12, %14 : vector<4x1xf32>
    %c0_13 = arith.constant 0 : index
    %c0_14 = arith.constant 0 : index
    %c0_15 = arith.constant 0 : index
    %c0_16 = arith.constant 0 : index
    %16 = vector.load %arg4[%c0_13, %c0_14, %c0_15, %c0_16] : memref<1x1x4x1xf32, #tpu.memory_space<vmem>>, vector<1x1x4x1xf32>
    %17 = vector.shape_cast %16 : vector<1x1x4x1xf32> to vector<4x1xf32>
    %18 = vector.shape_cast %15 : vector<4x1xf32> to vector<1x1x4x1xf32>
    tpu.vector_store %arg4[%c0_13, %c0_14, %c0_15, %c0_16], %18 {strides = array<i32>} : memref<1x1x4x1xf32, #tpu.memory_space<vmem>>, vector<1x1x4x1xf32>,
    %c0_17 = arith.constant 0 : index
    %c0_18 = arith.constant 0 : index
    %c0_19 = arith.constant 0 : index
    %c0_20 = arith.constant 0 : index
    %19 = vector.load %arg5[%c0_17, %c0_18, %c0_19, %c0_20] : memref<1x1x4x1xf32, #tpu.memory_space<vmem>>, vector<1x1x4x1xf32>
    %20 = vector.shape_cast %19 : vector<1x1x4x1xf32> to vector<4x1xf32>
    %21 = arith.mulf %4, %4 : vector<4x256xf32>
    %cst_21 = arith.constant dense<0.000000e+00> : vector<4xf32>
    %22 = vector.multi_reduction <add>, %21, %cst_21 [1] : vector<4x256xf32> to vector<4xf32>
    %23 = vector.shape_cast %22 : vector<4xf32> to vector<4x1xf32>
    %24 = arith.addf %20, %23 : vector<4x1xf32>
    %c0_22 = arith.constant 0 : index
    %c0_23 = arith.constant 0 : index
    %c0_24 = arith.constant 0 : index
    %c0_25 = arith.constant 0 : index
    %25 = vector.load %arg5[%c0_22, %c0_23, %c0_24, %c0_25] : memref<1x1x4x1xf32, #tpu.memory_space<vmem>>, vector<1x1x4x1xf32>
    %26 = vector.shape_cast %25 : vector<1x1x4x1xf32> to vector<4x1xf32>
    %27 = vector.shape_cast %24 : vector<4x1xf32> to vector<1x1x4x1xf32>
    tpu.vector_store %arg5[%c0_22, %c0_23, %c0_24, %c0_25], %27 {strides = array<i32>} : memref<1x1x4x1xf32, #tpu.memory_space<vmem>>, vector<1x1x4x1xf32>,
    return
  }
  func.func @transform_0(%arg0: i32, %arg1: i32, %arg2: i32) -> (i32, i32, i32) {
    %c1_i32 = arith.constant 1 : i32
    %0 = arith.muli %arg1, %c1_i32 : i32
    %1 = arith.addi %0, %arg2 : i32
    %c0_i32 = arith.constant 0 : i32
    %c0_i32_0 = arith.constant 0 : i32
    return %arg0, %c0_i32, %1 : i32, i32, i32
  }
  func.func @transform_1(%arg0: i32, %arg1: i32, %arg2: i32) -> (i32, i32, i32, i32) {
    %c0_i32 = arith.constant 0 : i32
    %c0_i32_0 = arith.constant 0 : i32
    %c0_i32_1 = arith.constant 0 : i32
    return %arg0, %arg1, %c0_i32, %c0_i32_0 : i32, i32, i32, i32
  }
  func.func @transform_2(%arg0: i32, %arg1: i32, %arg2: i32) -> (i32, i32, i32, i32) {
    %c0_i32 = arith.constant 0 : i32
    %c0_i32_0 = arith.constant 0 : i32
    %c0_i32_1 = arith.constant 0 : i32
    return %arg0, %arg1, %c0_i32, %c0_i32_0 : i32, i32, i32, i32
  }
  func.func @transform_3(%arg0: i32, %arg1: i32, %arg2: i32) -> (i32, i32, i32) {
    %c1_i32 = arith.constant 1 : i32
    %0 = arith.muli %arg1, %c1_i32 : i32
    %1 = arith.addi %0, %arg2 : i32
    %c0_i32 = arith.constant 0 : i32
    %c0_i32_0 = arith.constant 0 : i32
    return %arg0, %c0_i32, %1 : i32, i32, i32
  }
}

module attributes {stable_mosaic.version = 11 : i64} {
  func.func @_bn_conv_relu_kernel(%arg0: i32, %arg1: i32, %arg2: memref<1x4x256xbf16, #tpu.memory_space<vmem>>, %arg3: memref<8x4xbf16, #tpu.memory_space<vmem>>, %arg4: memref<8x1xf32, #tpu.memory_space<vmem>>, %arg5: memref<1x8x256xf32, #tpu.memory_space<vmem>>) attributes {dimension_semantics = [#tpu.dimension_semantics<parallel>, #tpu.dimension_semantics<parallel>], iteration_bounds = array<i64: 2, 1>, scalar_prefetch = 0 : i64, scratch_operands = 0 : i64, tpu.core_type = #tpu.core_type<tc>, window_params = [{transform_indices = @transform_0, window_bounds = array<i64: 1, 4, 256>}, {pipeline_mode = #tpu.pipeline_mode<synchronous>, transform_indices = @transform_1, window_bounds = array<i64: 8, 4>}, {pipeline_mode = #tpu.pipeline_mode<synchronous>, transform_indices = @transform_2, window_bounds = array<i64: 8, 1>}, {transform_indices = @transform_3, window_bounds = array<i64: 1, 8, 256>}]} {
    %c0 = arith.constant 0 : index
    %c0_0 = arith.constant 0 : index
    %0 = vector.load %arg3[%c0, %c0_0] : memref<8x4xbf16, #tpu.memory_space<vmem>>, vector<8x4xbf16>
    %c0_1 = arith.constant 0 : index
    %c0_2 = arith.constant 0 : index
    %c0_3 = arith.constant 0 : index
    %1 = vector.load %arg2[%c0_1, %c0_2, %c0_3] : memref<1x4x256xbf16, #tpu.memory_space<vmem>>, vector<1x4x256xbf16>
    %2 = vector.shape_cast %1 : vector<1x4x256xbf16> to vector<4x256xbf16>
    %cst = arith.constant dense<0.000000e+00> : vector<8x256xf32>
    %3 = tpu.matmul %0, %2, %cst {dimension_numbers = #tpu.dot_dimension_numbers<[1], [0], [0], [1], [0, 0, 1, 1], [], []>} : vector<8x4xbf16>, vector<4x256xbf16>, vector<8x256xf32> -> vector<8x256xf32>
    %c0_4 = arith.constant 0 : index
    %c0_5 = arith.constant 0 : index
    %4 = vector.load %arg4[%c0_4, %c0_5] : memref<8x1xf32, #tpu.memory_space<vmem>>, vector<8x1xf32>
    %5 = vector.broadcast %4 : vector<8x1xf32> to vector<8x256xf32>
    %6 = arith.addf %3, %5 : vector<8x256xf32>
    %cst_6 = arith.constant 0.000000e+00 : f32
    %7 = vector.broadcast %cst_6 : f32 to vector<8x256xf32>
    %8 = arith.maximumf %6, %7 : vector<8x256xf32>
    %c0_7 = arith.constant 0 : index
    %c0_8 = arith.constant 0 : index
    %c0_9 = arith.constant 0 : index
    %9 = vector.load %arg5[%c0_7, %c0_8, %c0_9] : memref<1x8x256xf32, #tpu.memory_space<vmem>>, vector<1x8x256xf32>
    %10 = vector.shape_cast %9 : vector<1x8x256xf32> to vector<8x256xf32>
    %11 = vector.shape_cast %8 : vector<8x256xf32> to vector<1x8x256xf32>
    tpu.vector_store %arg5[%c0_7, %c0_8, %c0_9], %11 {strides = array<i32>} : memref<1x8x256xf32, #tpu.memory_space<vmem>>, vector<1x8x256xf32>,
    return
  }
  func.func @transform_0(%arg0: i32, %arg1: i32) -> (i32, i32, i32) {
    %c0_i32 = arith.constant 0 : i32
    %c0_i32_0 = arith.constant 0 : i32
    return %arg0, %c0_i32, %arg1 : i32, i32, i32
  }
  func.func @transform_1(%arg0: i32, %arg1: i32) -> (i32, i32) {
    %c0_i32 = arith.constant 0 : i32
    %c0_i32_0 = arith.constant 0 : i32
    %c0_i32_1 = arith.constant 0 : i32
    return %c0_i32, %c0_i32_0 : i32, i32
  }
  func.func @transform_2(%arg0: i32, %arg1: i32) -> (i32, i32) {
    %c0_i32 = arith.constant 0 : i32
    %c0_i32_0 = arith.constant 0 : i32
    %c0_i32_1 = arith.constant 0 : i32
    return %c0_i32, %c0_i32_0 : i32, i32
  }
  func.func @transform_3(%arg0: i32, %arg1: i32) -> (i32, i32, i32) {
    %c0_i32 = arith.constant 0 : i32
    %c0_i32_0 = arith.constant 0 : i32
    return %arg0, %c0_i32, %arg1 : i32, i32, i32
  }
}

</mosaic_0001>

<bundles_post_ra>
// kernel: aspp_module_forward.3
= control target key start
LH: loop header
LB: loop body
LE: loop exit
PB: predicated region body
PF: predicated region fallthrough
CT: control target
= control target key end

     0   :  { %s458_s12 = smov 0   ;;  %s460_s13 = smov 0   ;;  %s497_s0 = inlined_call_operand.vmem [shape: bf16[2,4,256], index: 0, kind: input, shape index: {}]   ;;  %s498_s1 = inlined_call_operand.vmem [shape: bf16[8,4], index: 1, kind: input, shape index: {}]   ;;  %s499_s2 = inlined_call_operand.vmem [shape: f32[8,1], index: 2, kind: input, shape index: {}]   ;;  %s500_s3 = inlined_call_operand.vmem [shape: f32[2,8,256], index: 3, kind: output, shape index: {}]  }
   0x1   :  { %s462_s14 = smov 0  }
   0x2 LB: > { %s25_s15 = sadd.s32 1, %s431_s13  ;;  %p375_p0 = scmp.ge.s32.totalorder %s435_s14, 1  ;;  %s435_s14 = sphi %s462_s14, %s13_s14   ;;  %s431_s13 = sphi %s460_s13, %s502_s13   ;;  %s427_s12 = sphi %s458_s12, %s501_s12  }
   0x3   : > { %p27_p1 = scmp.ge.s32.totalorder %s25_s15, 2  ;;  %p158_p2 = scmp.lt.s32.totalorder %s435_s14, 3 }
   0x5   : > { %s504_s15 = smov (%p27_p1, %s25_s15), 0  ;;  %p159_p3 = pnand %p375_p0, %p158_p2 }
   0x6   : > { %p191_p4 = scmp.lt.s32.totalorder (!%p159_p3), %s427_s12, 1 }
   0x7   : > { %162 = sbr.rel (%p159_p3) target bundleno = 222 (0xde), region = 32 }
   0xc   : > { %v437_v0 = vmov 0   ;;  %v213_v1 = vld [vmem:[%s499_s2] sm:$0xff]  ;;  %s506_s12 = smov (!%p191_p4, %s427_s12), 1  ;;  %vm232_vm0 = vcmask 1041408   ;;  %vm228_vm1 = vcmask 31744  }
   0xd   : > { %271 = vmatprep.mubr.bf16.mxu0 %v437_v0  ;;  %412 = vset.pattern.permute.xlu0 %v437_v0  ;;  %s385_s18 = sshll.u32 %s506_s12, 2  ;;  %v211_v5 = vld [vmem:[%s498_s1] sm:$0xf]  ;;  %s386_s24 = sshll.u32 %s506_s12, 4 }
   0xe   : > { %216 = vperm.xlu0 %412, %v213_v1   ;;  %s198_s21 = scalar_lea.vmem %s497_s0, %s385_s18  ;;  %s208_s27 = scalar_lea.vmem %s500_s3, %s386_s24 }
   0xf   : > { %v380_v2 = vld.sshfl [vmem:[%s198_s21] sm:$0x33 pattern:$0x76325410] }
  0x10   : > { %v227_v3 = vcombine.high %v380_v2, %v380_v2  ;;  %v234_v4 = vsel %vm232_vm0, %v380_v2, 0 }
  0x12   : > { %381 = vmatprep.subr.msk.bf16.mxu0 %vm232_vm0, %v227_v3 }
  0x13   : > { %254 = vmatpush1.bf16.msra.mxu0 %v234_v4 }
  0x16   : > { %382 = vmatmul.mubr.msk.bf16.vlgmr.msra.gmra.mxu0 %vm228_vm1, %v211_v5 }
  0x89   : > { %v217_v6 = vpop.permute.xlu0 %216 }
  0xd6   : > { %v273_v7 = vpop.f32.mrf.mxu0 }
  0xd7   : > { %v274_v8 = vadd.f32 %v273_v7, %v217_v6 }
  0xd8   : > { %v275_v9 = vpop.f32.mrf.mxu0 }
  0xd9   : > { %v280_v10 = vmax.f32 %v274_v8, 0.0  ;;  %v276_v11 = vadd.f32 %v275_v9, %v217_v6 }
  0xda   : > { %v277_v12 = vpop.f32.mrf.mxu0 }
  0xdb   : > { %282 = vst [vmem:[%s208_s27] sm:$0xff] %v280_v10  ;;  %v281_v13 = vmax.f32 %v276_v11, 0.0 }
  0xdc   : > { %v278_v14 = vpop.f32.mrf.mxu0 }
  0xdd   : > { %283 = vst [vmem:[%s208_s27 + $0x8] sm:$0xff] %v281_v13 }
  0xde PF: > { %s13_s14 = sadd.s32 1, %s435_s14   ;;  %s501_s12 = smov %s431_s13 }
  0xdf   : > { %p10_p5 = scmp.ge.s32.totalorder %s13_s14, 4   ;;  %s502_s13 = smov %s504_s15 }
  0xe1   :  { %12 = sbr.rel (!%p10_p5) target bundleno = 2 (0x2), region = 62 }

// kernel: aspp_module_forward.2
= control target key start
LH: loop header
LB: loop body
LE: loop exit
PB: predicated region body
PF: predicated region fallthrough
CT: control target
= control target key end

     0   :  { %s576_s12 = smov 0   ;;  %s578_s13 = smov 0   ;;  %s623_s0 = inlined_call_operand.vmem [shape: f32[2,4,256], index: 0, kind: input, shape index: {}]   ;;  %s624_s1 = inlined_call_operand.vmem [shape: f32[2,1,4,1], index: 1, kind: output, shape index: {0}]   ;;  %s625_s2 = inlined_call_operand.vmem [shape: f32[2,1,4,1], index: 2, kind: output, shape index: {1}]   ;;  %s626_s3 = inlined_call_operand.vmem [shape: bf16[2,4,256], index: 3, kind: output, shape index: {2}]  }
   0x1   :  { %s580_s14 = smov 0  }
   0x2 LB: > { %s33_s15 = sadd.s32 1, %s549_s13  ;;  %p492_p0 = scmp.ge.s32.totalorder %s553_s14, 1  ;;  %s553_s14 = sphi %s580_s14, %s14_s14   ;;  %s549_s13 = sphi %s578_s13, %s628_s13   ;;  %s545_s12 = sphi %s576_s12, %s627_s12  }
   0x3   : > { %p35_p1 = scmp.ge.s32.totalorder %s33_s15, 2  ;;  %p180_p2 = scmp.lt.s32.totalorder %s553_s14, 3 }
   0x5   : > { %s630_s15 = smov (%p35_p1, %s33_s15), 0  ;;  %p181_p3 = pnand %p492_p0, %p180_p2 }
   0x6   : > { %p230_p4 = scmp.lt.s32.totalorder (!%p181_p3), %s545_s12, 1 }
   0x7   : > { %184 = sbr.rel (%p181_p3) target bundleno = 166 (0xa6), region = 24 }
   0xc   : > { %s632_s12 = smov (!%p230_p4, %s545_s12), 1  ;;  %vm270_vm0 = vcmask 3072   ;;  %vm292_vm1 = vcmask 1043456   ;;  %v555_v1 = vmov 0.0  }
   0xd   : > { %s503_s16 = sshll.u32 %s632_s12, 3  ;;  %s495_s17 = sshll.u32 %s632_s12, 2 }
   0xe   : > { %s237_s20 = scalar_lea.vmem %s623_s0, %s503_s16  ;;  %s246_s23 = scalar_lea.vmem %s624_s1, %s495_s17 }
   0xf   : > { %v273_v0 = vld [vmem:[%s237_s20] sm:$0xff]  ;;  %271 = vst.msk [vmem:[%s246_s23] sm:$0xf] %vm270_vm0, %v555_v1  ;;  %s263_s26 = scalar_lea.vmem %s626_s3, %s495_s17  ;;  %s253_s29 = scalar_lea.vmem %s625_s2, %s495_s17 }
  0x10   : > { %v275_v2 = vcombine.high %v273_v0, %v273_v0  ;;  %v293_v3 = vsel %vm292_vm1, %v273_v0, 0.0  ;;  %v302_v4 = vmul.f32 %v273_v0, %v273_v0  ;;  %272 = vst.msk [vmem:[%s253_s29] sm:$0xf] %vm270_vm0, %v555_v1 }
  0x12   : > { %v294_v5 = vsel %vm292_vm1, %v275_v2, 0.0  ;;  %v499_v6 = vpack.c.bf16 %v275_v2, %v273_v0  ;;  %v304_v7 = vcombine.high %v302_v4, %v302_v4  ;;  %v306_v8 = vsel %vm292_vm1, %v302_v4, 0.0 }
  0x13   : > { %v295_v9 = vadd.f32 %v294_v5, %v293_v3 }
  0x14   : > { %v307_v10 = vsel %vm292_vm1, %v304_v7, 0.0  ;;  %500 = vst.sshfl [vmem:[%s263_s26] sm:$0x33 pattern:$0x76325410] %v499_v6 }
  0x15   : > { %296 = vadd.xlane.f32.xlu0 %v295_v9  ;;  %v308_v11 = vadd.f32 %v307_v10, %v306_v8 }
  0x16   : > { %v291_v12 = vld [vmem:[%s246_s23] sm:$0xf] }
  0x17   : > { %v301_v15 = vld [vmem:[%s253_s29] sm:$0xf] }
  0x19   : > { %309 = vadd.xlane.f32.xlu0 %v308_v11 }
  0x9e   : > { %v297_v13 = vpop.xlane.xlu0 %296 }
  0x9f   : > { %v298_v14 = vadd.f32 %v297_v13, %v291_v12 }
  0xa1   : > { %300 = vst.msk [vmem:[%s246_s23] sm:$0xf] %vm270_vm0, %v298_v14 }
  0xa2   : > { %v310_v16 = vpop.xlane.xlu0 %309 }
  0xa3   : > { %v311_v17 = vadd.f32 %v310_v16, %v301_v15 }
  0xa5   : > { %312 = vst.msk [vmem:[%s253_s29] sm:$0xf] %vm270_vm0, %v311_v17 }
  0xa6 PF: > { %s14_s14 = sadd.s32 1, %s553_s14   ;;  %s627_s12 = smov %s549_s13 }
  0xa7   : > { %p11_p5 = scmp.ge.s32.totalorder %s14_s14, 4   ;;  %s628_s13 = smov %s630_s15 }
  0xa9   :  { %13 = sbr.rel (!%p11_p5) target bundleno = 2 (0x2), region = 82 }

</bundles_post_ra>
